<compile_context>
chip_gen: v6e
topology: v6e:2x2x1
jax: 0.10.0
libtpu: 0.0.40
codegen_flags: <defaults>
</compile_context>

<pallas_src>
import math

import jax
import jax.numpy as jnp
from jax.experimental import pallas as pl
from jax.experimental.pallas import tpu as pltpu

EPS = 1e-5


def _encoder_kernel(x_ref, ln1_w_ref, ln1_b_ref, ln2_w_ref, ln2_b_ref,
                    wvt_ref, w1_ref, b1_ref, w2_ref, b2_ref, o_ref):
    # x_ref block: (Bb, S, D) -- several batch elements per grid step.
    xb = x_ref[...].astype(jnp.float32)
    Bb, S, D = xb.shape
    inv_sqrt2 = 1.0 / math.sqrt(2.0)

    # Row-wise ops use the flattened (Bb*S, D) view (leading-dim merge is
    # layout-free) so the projection / MLP matmuls present tall operands.
    x2 = xb.reshape(Bb * S, D)

    # ---- LayerNorm 1 (biased variance, eps=1e-5), f32 on the VPU ----
    mu1 = jnp.mean(x2, axis=-1, keepdims=True)
    var1 = jnp.mean((x2 - mu1) ** 2, axis=-1, keepdims=True)
    h2 = (x2 - mu1) * jax.lax.rsqrt(var1 + EPS) * ln1_w_ref[...] + ln1_b_ref[...]

    # ---- "Enough" attention ----
    # Fused projection: [XW_v | theta(X)] = h @ [Wv^T | Wt^T].  Weights are
    # pre-transposed + fused into one (D, 2D) bf16 matrix in the wrapper, so
    # this is a single bf16 MXU matmul with f32 accumulation.
    h_bf = h2.astype(jnp.bfloat16)
    proj = jnp.dot(h_bf, wvt_ref[...], preferred_element_type=jnp.float32)  # (Bb*S, 2D)
    xwv = proj[:, :D].reshape(Bb, S, D)
    xth = proj[:, D:].reshape(Bb, S, D)

    # first_term: per-batch mean over seq, broadcast over rows.
    first = jnp.mean(xwv, axis=1, keepdims=True)                            # (Bb, 1, D)

    scale = 1.0 / (S * math.sqrt(D))
    h3_bf = h_bf.reshape(Bb, S, D)
    xwv_bf = xwv.astype(jnp.bfloat16)
    xth_bf = xth.astype(jnp.bfloat16)
    if S > D:
        # Associativity: (X theta^T) XWv == X (theta^T XWv) -> avoids the
        # (S,S) intermediate and cuts FLOPs when seq is long.
        inner = jnp.einsum('bsd,bse->bde', xth_bf, xwv_bf,
                           preferred_element_type=jnp.float32)              # (Bb, D, D)
        second = scale * jnp.einsum('bsd,bde->bse', h3_bf,
                                    inner.astype(jnp.bfloat16),
                                    preferred_element_type=jnp.float32)
    else:
        scores = jnp.einsum('bqd,bkd->bqk', h3_bf, xth_bf,
                            preferred_element_type=jnp.float32)             # (Bb, S, S)
        second = scale * jnp.einsum('bqk,bkd->bqd', scores.astype(jnp.bfloat16),
                                    xwv_bf, preferred_element_type=jnp.float32)

    # Residual is applied to norm1(x) -- matches the PyTorch module.
    y3 = h2.reshape(Bb, S, D) + first + second                              # (Bb, S, D)
    y2 = y3.reshape(Bb * S, D)

    # ---- LayerNorm 2 (f32) ----
    mu2 = jnp.mean(y2, axis=-1, keepdims=True)
    var2 = jnp.mean((y2 - mu2) ** 2, axis=-1, keepdims=True)
    z = (y2 - mu2) * jax.lax.rsqrt(var2 + EPS) * ln2_w_ref[...] + ln2_b_ref[...]

    # ---- MLP: Linear(D,4D) -> exact erf-GELU (EUP) -> Linear(4D,D) ----
    hmid = jnp.dot(z.astype(jnp.bfloat16), w1_ref[...],
                   preferred_element_type=jnp.float32) + b1_ref[...]
    g = 0.5 * hmid * (1.0 + jax.lax.erf(hmid * inv_sqrt2))
    m = jnp.dot(g.astype(jnp.bfloat16), w2_ref[...],
                preferred_element_type=jnp.float32) + b2_ref[...]

    o_ref[...] = (y2 + m).reshape(Bb, S, D).astype(o_ref.dtype)


def enough_vit_encoder(x, params, block_b=None):
    """x: (S, B, D) float32.  Returns (S, B, D)."""
    S, B, D = x.shape
    H = 4 * D
    xb = jnp.transpose(x, (1, 0, 2))  # (B, S, D)

    # Batch elements per grid step: target a few hundred (rows, D) rows of
    # work per step so the ~0.35us per-step pipeline overhead amortizes,
    # while keeping the per-step activation footprint well inside VMEM.
    if block_b is None:
        block_b = max(1, min(B, 512 // max(S, 1)))
    grid = (pl.cdiv(B, block_b),)

    # One-time wrapper-side weight prep (XLA, outside the kernel):
    #   - pre-transpose so the kernel never pays an XLU transpose per step,
    #   - fuse Wv / Wtheta into a single (D, 2D) projection,
    #   - cast matmul weights to bf16 (f32 accumulation inside the kernel).
    wvt = jnp.concatenate([params["wv"].T, params["wt"].T], axis=1).astype(jnp.bfloat16)
    w1t = params["w1"].T.astype(jnp.bfloat16)   # (D, H)
    w2t = params["w2"].T.astype(jnp.bfloat16)   # (H, D)

    full2d = lambda shape: pl.BlockSpec(shape, lambda b: (0, 0))

    # TODO(synk): for production sizes (D>=768 on v7x's 64 MiB VMEM) raise
    # vmem_limit_bytes / tile the MLP hidden dim; unnecessary at these shapes.
    out = pl.pallas_call(
        _encoder_kernel,
        out_shape=jax.ShapeDtypeStruct((B, S, D), x.dtype),
        grid=grid,
        in_specs=[
            pl.BlockSpec((block_b, S, D), lambda b: (b, 0, 0)),  # x
            full2d((1, D)),       # ln1 weight
            full2d((1, D)),       # ln1 bias
            full2d((1, D)),       # ln2 weight
            full2d((1, D)),       # ln2 bias
            full2d((D, 2 * D)),   # [Wv^T | Wtheta^T]  (bf16)
            full2d((D, H)),       # mlp W1^T           (bf16)
            full2d((1, H)),       # mlp b1
            full2d((H, D)),       # mlp W2^T           (bf16)
            full2d((1, D)),       # mlp b2
        ],
        out_specs=pl.BlockSpec((block_b, S, D), lambda b: (b, 0, 0)),
        compiler_params=pltpu.CompilerParams(
            dimension_semantics=("parallel",)),
    )(xb,
      params["ln1_w"].reshape(1, D), params["ln1_b"].reshape(1, D),
      params["ln2_w"].reshape(1, D), params["ln2_b"].reshape(1, D),
      wvt, w1t, params["b1"].reshape(1, H), w2t, params["b2"].reshape(1, D))
    return jnp.transpose(out, (1, 0, 2))


def ref_forward(x, p):
    """Pure-JAX reference mirroring the PyTorch module (eval mode)."""
    def ln(v, w, b):
        mu = v.mean(-1, keepdims=True)
        var = ((v - mu) ** 2).mean(-1, keepdims=True)
        return (v - mu) / jnp.sqrt(var + EPS) * w + b

    h = ln(x, p["ln1_w"], p["ln1_b"])                 # (S, B, D)
    X = jnp.transpose(h, (1, 0, 2))                   # (B, S, D)
    n, d = X.shape[1], X.shape[2]
    XWv = X @ p["wv"].T
    first = (jnp.ones((n, n), jnp.float32) @ XWv) / n
    scores = X @ jnp.transpose(X @ p["wt"].T, (0, 2, 1))
    second = (scores @ XWv) / (n * math.sqrt(d))
    Xr = X + first + second
    y = jnp.transpose(Xr, (1, 0, 2))                  # (S, B, D)
    z = ln(y, p["ln2_w"], p["ln2_b"])
    g = jax.nn.gelu(z @ p["w1"].T + p["b1"], approximate=False)
    m = g @ p["w2"].T + p["b2"]
    return y + m


def make_params(key, D):
    H = 4 * D
    ks = jax.random.split(key, 8)
    s = 0.1
    return {
        "ln1_w": jnp.ones((D,), jnp.float32) + s * jax.random.normal(ks[0], (D,)),
        "ln1_b": s * jax.random.normal(ks[1], (D,)),
        "ln2_w": jnp.ones((D,), jnp.float32) + s * jax.random.normal(ks[2], (D,)),
        "ln2_b": s * jax.random.normal(ks[3], (D,)),
        "wv": s * jax.random.normal(ks[4], (D, D), jnp.float32),
        "wt": s * jax.random.normal(ks[5], (D, D), jnp.float32),
        "w1": s * jax.random.normal(ks[6], (H, D), jnp.float32),
        "b1": jnp.zeros((H,), jnp.float32),
        "w2": s * jax.random.normal(ks[7], (D, H), jnp.float32),
        "b2": jnp.zeros((D,), jnp.float32),
    }


if __name__ == "__main__":
    S, B, D = 8, 2, 32      # seq, batch, embed_size (num_heads unused by the math)
    key = jax.random.PRNGKey(0)
    kx, kp = jax.random.split(key)
    x = jax.random.normal(kx, (S, B, D), jnp.float32)
    params = make_params(kp, D)

    out = enough_vit_encoder(x, params)
    out = jax.block_until_ready(out)

    ref = ref_forward(x, params)
    assert out.shape == (S, B, D)
    assert jnp.allclose(out, ref, rtol=1e-2, atol=1e-2), "mismatch vs reference"
    print("KERNEL_OK")
</pallas_src>

<mosaic_0001>
module attributes {stable_mosaic.version = 11 : i64} {
  func.func @_encoder_kernel(%arg0: i32, %arg1: memref<2x8x32xf32, #tpu.memory_space<vmem>>, %arg2: memref<1x32xf32, #tpu.memory_space<vmem>>, %arg3: memref<1x32xf32, #tpu.memory_space<vmem>>, %arg4: memref<1x32xf32, #tpu.memory_space<vmem>>, %arg5: memref<1x32xf32, #tpu.memory_space<vmem>>, %arg6: memref<32x64xbf16, #tpu.memory_space<vmem>>, %arg7: memref<32x128xbf16, #tpu.memory_space<vmem>>, %arg8: memref<1x128xf32, #tpu.memory_space<vmem>>, %arg9: memref<128x32xbf16, #tpu.memory_space<vmem>>, %arg10: memref<1x32xf32, #tpu.memory_space<vmem>>, %arg11: memref<2x8x32xf32, #tpu.memory_space<vmem>>) attributes {dimension_semantics = [#tpu.dimension_semantics<parallel>], iteration_bounds = array<i64: 1>, scalar_prefetch = 0 : i64, scratch_operands = 0 : i64, tpu.core_type = #tpu.core_type<tc>, window_params = [{transform_indices = @transform_0, window_bounds = array<i64: 2, 8, 32>}, {pipeline_mode = #tpu.pipeline_mode<synchronous>, transform_indices = @transform_1, window_bounds = array<i64: 1, 32>}, {pipeline_mode = #tpu.pipeline_mode<synchronous>, transform_indices = @transform_2, window_bounds = array<i64: 1, 32>}, {pipeline_mode = #tpu.pipeline_mode<synchronous>, transform_indices = @transform_3, window_bounds = array<i64: 1, 32>}, {pipeline_mode = #tpu.pipeline_mode<synchronous>, transform_indices = @transform_4, window_bounds = array<i64: 1, 32>}, {pipeline_mode = #tpu.pipeline_mode<synchronous>, transform_indices = @transform_5, window_bounds = array<i64: 32, 64>}, {pipeline_mode = #tpu.pipeline_mode<synchronous>, transform_indices = @transform_6, window_bounds = array<i64: 32, 128>}, {pipeline_mode = #tpu.pipeline_mode<synchronous>, transform_indices = @transform_7, window_bounds = array<i64: 1, 128>}, {pipeline_mode = #tpu.pipeline_mode<synchronous>, transform_indices = @transform_8, window_bounds = array<i64: 128, 32>}, {pipeline_mode = #tpu.pipeline_mode<synchronous>, transform_indices = @transform_9, window_bounds = array<i64: 1, 32>}, {transform_indices = @transform_10, window_bounds = array<i64: 2, 8, 32>}]} {
    %c0 = arith.constant 0 : index
    %c0_0 = arith.constant 0 : index
    %c0_1 = arith.constant 0 : index
    %0 = vector.load %arg1[%c0, %c0_0, %c0_1] : memref<2x8x32xf32, #tpu.memory_space<vmem>>, vector<2x8x32xf32>
    %1 = vector.shape_cast %0 : vector<2x8x32xf32> to vector<16x32xf32>
    %cst = arith.constant dense<0.000000e+00> : vector<16xf32>
    %2 = vector.multi_reduction <add>, %1, %cst [1] : vector<16x32xf32> to vector<16xf32>
    %3 = vector.shape_cast %2 : vector<16xf32> to vector<16x1xf32>
    %cst_2 = arith.constant 3.200000e+01 : f32
    %4 = vector.broadcast %cst_2 : f32 to vector<16x1xf32>
    %5 = arith.divf %3, %4 : vector<16x1xf32>
    %6 = vector.broadcast %5 : vector<16x1xf32> to vector<16x32xf32>
    %7 = arith.subf %1, %6 : vector<16x32xf32>
    %8 = arith.mulf %7, %7 : vector<16x32xf32>
    %cst_3 = arith.constant dense<0.000000e+00> : vector<16xf32>
    %9 = vector.multi_reduction <add>, %8, %cst_3 [1] : vector<16x32xf32> to vector<16xf32>
    %10 = vector.shape_cast %9 : vector<16xf32> to vector<16x1xf32>
    %cst_4 = arith.constant 3.200000e+01 : f32
    %11 = vector.broadcast %cst_4 : f32 to vector<16x1xf32>
    %12 = arith.divf %10, %11 : vector<16x1xf32>
    %13 = vector.broadcast %5 : vector<16x1xf32> to vector<16x32xf32>
    %14 = arith.subf %1, %13 : vector<16x32xf32>
    %cst_5 = arith.constant 9.99999974E-6 : f32
    %15 = vector.broadcast %cst_5 : f32 to vector<16x1xf32>
    %16 = arith.addf %12, %15 : vector<16x1xf32>
    %17 = math.rsqrt %16 : vector<16x1xf32>
    %18 = vector.broadcast %17 : vector<16x1xf32> to vector<16x32xf32>
    %19 = arith.mulf %14, %18 : vector<16x32xf32>
    %c0_6 = arith.constant 0 : index
    %c0_7 = arith.constant 0 : index
    %20 = vector.load %arg2[%c0_6, %c0_7] : memref<1x32xf32, #tpu.memory_space<vmem>>, vector<1x32xf32>
    %21 = vector.broadcast %20 : vector<1x32xf32> to vector<16x32xf32>
    %22 = arith.mulf %19, %21 : vector<16x32xf32>
    %c0_8 = arith.constant 0 : index
    %c0_9 = arith.constant 0 : index
    %23 = vector.load %arg3[%c0_8, %c0_9] : memref<1x32xf32, #tpu.memory_space<vmem>>, vector<1x32xf32>
    %24 = vector.broadcast %23 : vector<1x32xf32> to vector<16x32xf32>
    %25 = arith.addf %22, %24 : vector<16x32xf32>
    %26 = arith.truncf %25 : vector<16x32xf32> to vector<16x32xbf16>
    %c0_10 = arith.constant 0 : index
    %c0_11 = arith.constant 0 : index
    %27 = vector.load %arg6[%c0_10, %c0_11] : memref<32x64xbf16, #tpu.memory_space<vmem>>, vector<32x64xbf16>
    %cst_12 = arith.constant dense<0.000000e+00> : vector<16x64xf32>
    %28 = tpu.matmul %26, %27, %cst_12 {dimension_numbers = #tpu.dot_dimension_numbers<[1], [0], [0], [1], [0, 0, 1, 1], [], []>} : vector<16x32xbf16>, vector<32x64xbf16>, vector<16x64xf32> -> vector<16x64xf32>
    %29 = vector.extract_strided_slice %28 {offsets = [0, 0], sizes = [16, 32], strides = [1, 1]} : vector<16x64xf32> to vector<16x32xf32>
    %30 = vector.shape_cast %29 : vector<16x32xf32> to vector<2x8x32xf32>
    %31 = vector.extract_strided_slice %28 {offsets = [0, 32], sizes = [16, 32], strides = [1, 1]} : vector<16x64xf32> to vector<16x32xf32>
    %32 = vector.shape_cast %31 : vector<16x32xf32> to vector<2x8x32xf32>
    %cst_13 = arith.constant dense<0.000000e+00> : vector<2x32xf32>
    %33 = vector.multi_reduction <add>, %30, %cst_13 [1] : vector<2x8x32xf32> to vector<2x32xf32>
    %34 = vector.shape_cast %33 : vector<2x32xf32> to vector<2x1x32xf32>
    %cst_14 = arith.constant 8.000000e+00 : f32
    %35 = vector.broadcast %cst_14 : f32 to vector<2x1x32xf32>
    %36 = arith.divf %34, %35 : vector<2x1x32xf32>
    %37 = vector.shape_cast %26 : vector<16x32xbf16> to vector<2x8x32xbf16>
    %38 = arith.truncf %30 : vector<2x8x32xf32> to vector<2x8x32xbf16>
    %39 = arith.truncf %32 : vector<2x8x32xf32> to vector<2x8x32xbf16>
    "tpu.trace_start"() <{level = 10 : i32, message = "bqd,bkd->bqk"}> : () -> ()
    %cst_15 = arith.constant dense<0.000000e+00> : vector<2x8x8xf32>
    %40 = tpu.matmul %37, %39, %cst_15 {dimension_numbers = #tpu.dot_dimension_numbers<[2], [2], [1], [1], [0, 0, 0, 1, 1, 1], [0], [0]>} : vector<2x8x32xbf16>, vector<2x8x32xbf16>, vector<2x8x8xf32> -> vector<2x8x8xf32>
    "tpu.trace_stop"() : () -> ()
    %41 = arith.truncf %40 : vector<2x8x8xf32> to vector<2x8x8xbf16>
    "tpu.trace_start"() <{level = 10 : i32, message = "bqk,bkd->bqd"}> : () -> ()
    %cst_16 = arith.constant dense<0.000000e+00> : vector<2x8x32xf32>
    %42 = tpu.matmul %41, %38, %cst_16 {dimension_numbers = #tpu.dot_dimension_numbers<[2], [1], [1], [2], [0, 0, 0, 1, 1, 2], [0], [0]>} : vector<2x8x8xbf16>, vector<2x8x32xbf16>, vector<2x8x32xf32> -> vector<2x8x32xf32>
    "tpu.trace_stop"() : () -> ()
    %cst_17 = arith.constant 0.0220970865 : f32
    %43 = vector.broadcast %cst_17 : f32 to vector<2x8x32xf32>
    %44 = arith.mulf %43, %42 : vector<2x8x32xf32>
    %45 = vector.shape_cast %25 : vector<16x32xf32> to vector<2x8x32xf32>
    %46 = vector.broadcast %36 : vector<2x1x32xf32> to vector<2x8x32xf32>
    %47 = arith.addf %45, %46 : vector<2x8x32xf32>
    %48 = arith.addf %47, %44 : vector<2x8x32xf32>
    %49 = vector.shape_cast %48 : vector<2x8x32xf32> to vector<16x32xf32>
    %cst_18 = arith.constant dense<0.000000e+00> : vector<16xf32>
    %50 = vector.multi_reduction <add>, %49, %cst_18 [1] : vector<16x32xf32> to vector<16xf32>
    %51 = vector.shape_cast %50 : vector<16xf32> to vector<16x1xf32>
    %cst_19 = arith.constant 3.200000e+01 : f32
    %52 = vector.broadcast %cst_19 : f32 to vector<16x1xf32>
    %53 = arith.divf %51, %52 : vector<16x1xf32>
    %54 = vector.broadcast %53 : vector<16x1xf32> to vector<16x32xf32>
    %55 = arith.subf %49, %54 : vector<16x32xf32>
    %56 = arith.mulf %55, %55 : vector<16x32xf32>
    %cst_20 = arith.constant dense<0.000000e+00> : vector<16xf32>
    %57 = vector.multi_reduction <add>, %56, %cst_20 [1] : vector<16x32xf32> to vector<16xf32>
    %58 = vector.shape_cast %57 : vector<16xf32> to vector<16x1xf32>
    %cst_21 = arith.constant 3.200000e+01 : f32
    %59 = vector.broadcast %cst_21 : f32 to vector<16x1xf32>
    %60 = arith.divf %58, %59 : vector<16x1xf32>
    %61 = vector.broadcast %53 : vector<16x1xf32> to vector<16x32xf32>
    %62 = arith.subf %49, %61 : vector<16x32xf32>
    %cst_22 = arith.constant 9.99999974E-6 : f32
    %63 = vector.broadcast %cst_22 : f32 to vector<16x1xf32>
    %64 = arith.addf %60, %63 : vector<16x1xf32>
    %65 = math.rsqrt %64 : vector<16x1xf32>
    %66 = vector.broadcast %65 : vector<16x1xf32> to vector<16x32xf32>
    %67 = arith.mulf %62, %66 : vector<16x32xf32>
    %c0_23 = arith.constant 0 : index
    %c0_24 = arith.constant 0 : index
    %68 = vector.load %arg4[%c0_23, %c0_24] : memref<1x32xf32, #tpu.memory_space<vmem>>, vector<1x32xf32>
    %69 = vector.broadcast %68 : vector<1x32xf32> to vector<16x32xf32>
    %70 = arith.mulf %67, %69 : vector<16x32xf32>
    %c0_25 = arith.constant 0 : index
    %c0_26 = arith.constant 0 : index
    %71 = vector.load %arg5[%c0_25, %c0_26] : memref<1x32xf32, #tpu.memory_space<vmem>>, vector<1x32xf32>
    %72 = vector.broadcast %71 : vector<1x32xf32> to vector<16x32xf32>
    %73 = arith.addf %70, %72 : vector<16x32xf32>
    %74 = arith.truncf %73 : vector<16x32xf32> to vector<16x32xbf16>
    %c0_27 = arith.constant 0 : index
    %c0_28 = arith.constant 0 : index
    %75 = vector.load %arg7[%c0_27, %c0_28] : memref<32x128xbf16, #tpu.memory_space<vmem>>, vector<32x128xbf16>
    %cst_29 = arith.constant dense<0.000000e+00> : vector<16x128xf32>
    %76 = tpu.matmul %74, %75, %cst_29 {dimension_numbers = #tpu.dot_dimension_numbers<[1], [0], [0], [1], [0, 0, 1, 1], [], []>} : vector<16x32xbf16>, vector<32x128xbf16>, vector<16x128xf32> -> vector<16x128xf32>
    %c0_30 = arith.constant 0 : index
    %c0_31 = arith.constant 0 : index
    %77 = vector.load %arg8[%c0_30, %c0_31] : memref<1x128xf32, #tpu.memory_space<vmem>>, vector<1x128xf32>
    %78 = vector.broadcast %77 : vector<1x128xf32> to vector<16x128xf32>
    %79 = arith.addf %76, %78 : vector<16x128xf32>
    %cst_32 = arith.constant 5.000000e-01 : f32
    %80 = vector.broadcast %cst_32 : f32 to vector<16x128xf32>
    %81 = arith.mulf %80, %79 : vector<16x128xf32>
    %cst_33 = arith.constant 0.707106769 : f32
    %82 = vector.broadcast %cst_33 : f32 to vector<16x128xf32>
    %83 = arith.mulf %79, %82 : vector<16x128xf32>
    %84 = math.erf %83 : vector<16x128xf32>
    %cst_34 = arith.constant 1.000000e+00 : f32
    %85 = vector.broadcast %cst_34 : f32 to vector<16x128xf32>
    %86 = arith.addf %85, %84 : vector<16x128xf32>
    %87 = arith.mulf %81, %86 : vector<16x128xf32>
    %88 = arith.truncf %87 : vector<16x128xf32> to vector<16x128xbf16>
    %c0_35 = arith.constant 0 : index
    %c0_36 = arith.constant 0 : index
    %89 = vector.load %arg9[%c0_35, %c0_36] : memref<128x32xbf16, #tpu.memory_space<vmem>>, vector<128x32xbf16>
    %cst_37 = arith.constant dense<0.000000e+00> : vector<16x32xf32>
    %90 = tpu.matmul %88, %89, %cst_37 {dimension_numbers = #tpu.dot_dimension_numbers<[1], [0], [0], [1], [0, 0, 1, 1], [], []>} : vector<16x128xbf16>, vector<128x32xbf16>, vector<16x32xf32> -> vector<16x32xf32>
    %c0_38 = arith.constant 0 : index
    %c0_39 = arith.constant 0 : index
    %91 = vector.load %arg10[%c0_38, %c0_39] : memref<1x32xf32, #tpu.memory_space<vmem>>, vector<1x32xf32>
    %92 = vector.broadcast %91 : vector<1x32xf32> to vector<16x32xf32>
    %93 = arith.addf %90, %92 : vector<16x32xf32>
    %94 = arith.addf %49, %93 : vector<16x32xf32>
    %95 = vector.shape_cast %94 : vector<16x32xf32> to vector<2x8x32xf32>
    %c0_40 = arith.constant 0 : index
    %c0_41 = arith.constant 0 : index
    %c0_42 = arith.constant 0 : index
    %96 = vector.load %arg11[%c0_40, %c0_41, %c0_42] : memref<2x8x32xf32, #tpu.memory_space<vmem>>, vector<2x8x32xf32>
    tpu.vector_store %arg11[%c0_40, %c0_41, %c0_42], %95 {strides = array<i32>} : memref<2x8x32xf32, #tpu.memory_space<vmem>>, vector<2x8x32xf32>,
    return
  }
  func.func @transform_0(%arg0: i32) -> (i32, i32, i32) {
    %c0_i32 = arith.constant 0 : i32
    %c0_i32_0 = arith.constant 0 : i32
    %c0_i32_1 = arith.constant 0 : i32
    return %arg0, %c0_i32, %c0_i32_0 : i32, i32, i32
  }
  func.func @transform_1(%arg0: i32) -> (i32, i32) {
    %c0_i32 = arith.constant 0 : i32
    %c0_i32_0 = arith.constant 0 : i32
    %c0_i32_1 = arith.constant 0 : i32
    return %c0_i32, %c0_i32_0 : i32, i32
  }
  func.func @transform_2(%arg0: i32) -> (i32, i32) {
    %c0_i32 = arith.constant 0 : i32
    %c0_i32_0 = arith.constant 0 : i32
    %c0_i32_1 = arith.constant 0 : i32
    return %c0_i32, %c0_i32_0 : i32, i32
  }
  func.func @transform_3(%arg0: i32) -> (i32, i32) {
    %c0_i32 = arith.constant 0 : i32
    %c0_i32_0 = arith.constant 0 : i32
    %c0_i32_1 = arith.constant 0 : i32
    return %c0_i32, %c0_i32_0 : i32, i32
  }
  func.func @transform_4(%arg0: i32) -> (i32, i32) {
    %c0_i32 = arith.constant 0 : i32
    %c0_i32_0 = arith.constant 0 : i32
    %c0_i32_1 = arith.constant 0 : i32
    return %c0_i32, %c0_i32_0 : i32, i32
  }
  func.func @transform_5(%arg0: i32) -> (i32, i32) {
    %c0_i32 = arith.constant 0 : i32
    %c0_i32_0 = arith.constant 0 : i32
    %c0_i32_1 = arith.constant 0 : i32
    return %c0_i32, %c0_i32_0 : i32, i32
  }
  func.func @transform_6(%arg0: i32) -> (i32, i32) {
    %c0_i32 = arith.constant 0 : i32
    %c0_i32_0 = arith.constant 0 : i32
    %c0_i32_1 = arith.constant 0 : i32
    return %c0_i32, %c0_i32_0 : i32, i32
  }
  func.func @transform_7(%arg0: i32) -> (i32, i32) {
    %c0_i32 = arith.constant 0 : i32
    %c0_i32_0 = arith.constant 0 : i32
    %c0_i32_1 = arith.constant 0 : i32
    return %c0_i32, %c0_i32_0 : i32, i32
  }
  func.func @transform_8(%arg0: i32) -> (i32, i32) {
    %c0_i32 = arith.constant 0 : i32
    %c0_i32_0 = arith.constant 0 : i32
    %c0_i32_1 = arith.constant 0 : i32
    return %c0_i32, %c0_i32_0 : i32, i32
  }
  func.func @transform_9(%arg0: i32) -> (i32, i32) {
    %c0_i32 = arith.constant 0 : i32
    %c0_i32_0 = arith.constant 0 : i32
    %c0_i32_1 = arith.constant 0 : i32
    return %c0_i32, %c0_i32_0 : i32, i32
  }
  func.func @transform_10(%arg0: i32) -> (i32, i32, i32) {
    %c0_i32 = arith.constant 0 : i32
    %c0_i32_0 = arith.constant 0 : i32
    %c0_i32_1 = arith.constant 0 : i32
    return %arg0, %c0_i32, %c0_i32_0 : i32, i32, i32
  }
}

</mosaic_0001>

<bundles_post_ra>
// kernel: tpu_custom_call.1
= control target key start
LH: loop header
LB: loop body
LE: loop exit
PB: predicated region body
PF: predicated region fallthrough
CT: control target
= control target key end

     0   :  { %vm39_vm0 = vcmask 261120   ;;  %s982_s0 = inlined_call_operand.vmem [shape: f32[2,8,32], index: 0, kind: input, shape index: {}]   ;;  %s983_s1 = inlined_call_operand.vmem [shape: f32[1,32], index: 1, kind: input, shape index: {}]   ;;  %s984_s2 = inlined_call_operand.vmem [shape: f32[1,32], index: 2, kind: input, shape index: {}]   ;;  %s985_s3 = inlined_call_operand.vmem [shape: f32[1,32], index: 3, kind: input, shape index: {}]   ;;  %s986_s4 = inlined_call_operand.vmem [shape: f32[1,32], index: 4, kind: input, shape index: {}]   ;;  %s987_s5 = inlined_call_operand.vmem [shape: bf16[32,64], index: 5, kind: input, shape index: {}]   ;;  %s988_s6 = inlined_call_operand.vmem [shape: bf16[32,128], index: 6, kind: input, shape index: {}]   ;;  %s989_s7 = inlined_call_operand.vmem [shape: f32[1,128], index: 7, kind: input, shape index: {}]   ;;  %s990_s8 = inlined_call_operand.vmem [shape: bf16[128,32], index: 8, kind: input, shape index: {}]   ;;  %s991_s9 = inlined_call_operand.vmem [shape: f32[1,32], index: 9, kind: input, shape index: {}]   ;;  %s992_s10 = inlined_call_operand.hbm [shape: f32[2,8,32], index: 10, kind: output, shape index: {}]  }
   0x1   :  { %v37_v0 = vld [vmem:[%s982_s0] sm:$0xff]  ;;  %v38_v1 = vld [vmem:[%s982_s0 + $0x8] sm:$0xff] }
   0x2   :  { %v40_v2 = vsel %vm39_vm0, %v37_v0, 0.0  ;;  %v43_v3 = vsel %vm39_vm0, %v38_v1, 0.0 }
   0x3   :  { %41 = vadd.xlane.f32.xlu0 %v40_v2 }
   0x7   :  { %44 = vadd.xlane.f32.xlu0 %v43_v3 }
   0x8   :  { %15 = vsyncpa [#allocation3], 0  ;;  %v742_v14 = vld [vmem:[%s987_s5 + $0x8] sm:$0xff]   ;;  %v788_v15 = vmov 0.0   ;;  %v743_v16 = vld [vmem:[%s987_s5] sm:$0xff]   ;;  %vm789_vm1 = vmmov 0  }
   0x9   :  { %676 = vmatprep.subr.bf16.mxu1 %v788_v15  ;;  %702 = vmatprep.subr.bf16.mxu0 %v788_v15  ;;  %v625_v25 = vld [vmem:[%s983_s1] ss:$0 sm:$0xff]  ;;  %vm274_vm2 = vcmask 1043456   ;;  %s790_s1 = smov 96   ;;  %vm270_vm3 = vcmask 64512  }
   0xa   :  { %677 = vmatpush3.bf16.msra.mxu1 %v742_v14  ;;  %680 = vmatprep.mubr.msk.bf16.mxu1 %vm789_vm1, %v788_v15  ;;  %v626_v29 = vld [vmem:[%s984_s2] ss:$0 sm:$0xff] }
   0xb   :  { %678 = vmatprep.subr.bf16.mxu1 %v788_v15  ;;  %704 = vmatprep.mubr.msk.bf16.mxu0 %vm789_vm1, %v788_v15 }
   0xe   :  { %679 = vmatpush3.bf16.msra.mxu1 %v743_v16 }
   0xf   :  { %684 = vmatprep.subr.bf16.mxu1 %v788_v15 }
  0x8c   :  { %v42_v4 = vpop.xlane.xlu0 %41 }
  0x8d   :  { %v47_v5 = vmul.f32 0.03125, %v42_v4 }
  0x8f   :  { %v49_v6 = vsub.f32 %v37_v0, %v47_v5 }
  0x90   :  { %v45_v7 = vpop.xlane.xlu0 %44 }
  0x91   :  { %v48_v8 = vmul.f32 0.03125, %v45_v7  ;;  %v51_v9 = vmul.f32 %v49_v6, %v49_v6 }
  0x93   :  { %v50_v10 = vsub.f32 %v38_v1, %v48_v8  ;;  %v53_v11 = vsel %vm39_vm0, %v51_v9, 0.0 }
  0x94   :  { %54 = vadd.xlane.f32.xlu1 %v53_v11 }
  0x95   :  { %v52_v12 = vmul.f32 %v50_v10, %v50_v10 }
  0x97   :  { %v56_v13 = vsel %vm39_vm0, %v52_v12, 0.0 }
  0x98   :  { %57 = vadd.xlane.f32.xlu1 %v56_v13 }
 0x11d   :  { %v55_v17 = vpop.xlane.xlu1 %54 }
 0x11e   :  { %v59_v18 = vmul.f32 0.03125, %v55_v17 }
 0x120   :  { %v61_v19 = vadd.f32 1e-05, %v59_v18 }
 0x121   :  { %v58_v20 = vpop.xlane.xlu1 %57 }
 0x122   :  { %754 = vrsqrt.f32 %v61_v19  ;;  %v60_v21 = vmul.f32 0.03125, %v58_v20 }
 0x124   :  { %v62_v22 = vadd.f32 1e-05, %v60_v21 }
 0x126   :  { %756 = vrsqrt.f32 %v62_v22 }
 0x12f   :  { %v755_v23 = vpop.eup %754 }
 0x130   :  { %v65_v24 = vmul.f32 %v755_v23, %v49_v6 }
 0x132   :  { %v74_v28 = vmul.f32 %v625_v25, %v65_v24 }
 0x133   :  { %v757_v26 = vpop.eup %756 }
 0x134   :  { %v66_v27 = vmul.f32 %v757_v26, %v50_v10  ;;  %v879_v31 = vadd.f32 %v626_v29, %v74_v28 }
 0x136   :  { %v75_v30 = vmul.f32 %v625_v25, %v66_v27  ;;  %v651_v45 = vpack.c.bf16 %v879_v31, %v879_v31 }
 0x138   :  { %v881_v32 = vadd.f32 %v626_v29, %v75_v30 }
 0x13a   :  { %v85_v33 = vpack.c.bf16 %v881_v32, %v879_v31  ;;  %v652_v47 = vpack.c.bf16 %v881_v32, %v881_v32 }
 0x13c   :  { %681 = vmatmul.mubr.msk.bf16.vlgmr.msra.gmra.mxu1 %vm39_vm0, %v85_v33 }
 0x13d   :  { %686 = vmatprep.mubr.msk.bf16.mxu1 %vm789_vm1, %v788_v15 }
 0x1fc   :  { %v139_v34 = vpop.f32.mrf.mxu1 }
 0x1fd   :  { %v168_v35 = vpack.c.bf16 %v139_v34, %v139_v34  ;;  %v146_v58 = vsel %vm39_vm0, %v139_v34, 0.0 }
 0x1fe   :  { %v682_v36 = vpop.f32.mrf.mxu1  ;;  %v147_v59 = vrot.slane %v146_v58, 4 }
 0x1ff   :  { %171 = vrot.lane.b32.xlu0 %v168_v35, %s790_s1  ;;  %v276_v37 = vsel %vm274_vm2, %v168_v35, 0 }
 0x200   :  { %v142_v38 = vpop.f32.mrf.mxu1  ;;  %v148_v60 = vadd.f32 %v147_v59, %v146_v58  ;;  %v748_v58 = vld [vmem:[%s990_s8 + $0x28] sm:$0xff]   ;;  %v749_v59 = vld [vmem:[%s990_s8 + $0x20] sm:$0xff]  }
 0x201   :  { %v169_v39 = vpack.c.bf16 %v142_v38, %v142_v38  ;;  %v153_v61 = vsel %vm39_vm0, %v142_v38, 0.0  ;;  %v745_v38 = vld [vmem:[%s988_s6] sm:$0xff]  }
 0x202   :  { %v683_v40 = vpop.f32.mrf.mxu1  ;;  %v149_v62 = vrot.slane %v148_v60, 2  ;;  %v154_v63 = vrot.slane %v153_v61, 4 }
 0x203   :  { %220 = vrot.lane.b32.xlu1 %v169_v39, %s790_s1  ;;  %v322_v41 = vsel %vm274_vm2, %v169_v39, 0  ;;  %v746_v39 = vld [vmem:[%s990_s8 + $0x38] sm:$0xff]   ;;  %s791_s1 = smov [#allocation2]  }
 0x204   :  { %703 = vmatpush3.bf16.msra.mxu0 %v322_v41  ;;  %v150_v0 = vadd.f32 %v149_v62, %v148_v60  ;;  %v155_v1 = vadd.f32 %v154_v63, %v153_v61  ;;  %v750_v60 = vld [vmem:[%s990_s8 + $0x18] sm:$0xff]   ;;  %v751_v61 = vld [vmem:[%s990_s8 + $0x10] sm:$0xff]   ;;  %v752_v62 = vld [vmem:[%s990_s8 + $0x8] sm:$0xff]   ;;  %s614_s2 = sshll.u32 %s791_s1, 4  ;;  %s615_s2 = int_to_ptr.vmem [resolvable:$true] %s614_s2 }
 0x205   :  { %716 = vmatprep.subr.bf16.mxu0 %v788_v15  ;;  %v753_v63 = vld [vmem:[%s990_s8] sm:$0xff]   ;;  %s766_s23 = scalar_lea.vmem %s615_s2, 256  ;;  %p771_p1 = scmp.lt.s32.totalorder %s615_s2, %s615_s2 }
 0x206   :  { %v151_v2 = vrot.slane %v150_v0, 1  ;;  %v156_v3 = vrot.slane %v155_v1, 2  ;;  %p767_p0 = scmp.ne.s32.totalorder %s615_s2, %s766_s23  ;;  %p772_p2 = scmp.lt.s32.totalorder %s766_s23, %s766_s23 }
 0x208   :  { %v152_v4 = vadd.f32 %v151_v2, %v150_v0  ;;  %v157_v5 = vadd.f32 %v156_v3, %v155_v1  ;;  %v638_v0 = vld [vmem:[%s989_s7] ss:$0 sm:$0xff]  ;;  %p773_p3 = por %p772_p2, %p771_p1 }
 0x20a   :  { %v158_v6 = vrot.slane %v157_v5, 1  ;;  %v161_v7 = vmul.f32 0.125, %v152_v4  ;;  %p774_p4 = pnand %p773_p3, %p767_p0 }
 0x20c   :  { %v159_v9 = vadd.f32 %v158_v6, %v157_v5  ;;  %v366_v11 = vadd.f32 %v161_v7, %v879_v31 }
 0x20e   :  { %v162_v17 = vmul.f32 0.125, %v159_v9 }
 0x210   :  { %v367_v21 = vadd.f32 %v162_v17, %v881_v32 }
 0x271   :  { %v172_v42 = vpop.permute.xlu0 %171 }
 0x272   :  { %v177_v43 = vsel %vm39_vm0, %v172_v42, 0 }
 0x273   :  { %685 = vmatpush3.bf16.xpose.msra.mxu1 %v177_v43 }
 0x274   :  { %690 = vmatprep.subr.bf16.mxu1 %v788_v15 }
 0x275   :  { %v221_v44 = vpop.permute.xlu1 %220 }
 0x276   :  { %v226_v46 = vsel %vm39_vm0, %v221_v44, 0 }
 0x27a   :  { %687 = vmatmul.mubr.msk.bf16.vlgmr.msra.gmra.mxu1 %vm39_vm0, %v651_v45 }
 0x27b   :  { %691 = vmatpush3.bf16.xpose.msra.mxu1 %v226_v46  ;;  %692 = vmatprep.mubr.msk.bf16.mxu1 %vm789_vm1, %v788_v15 }
 0x27c   :  { %696 = vmatprep.subr.bf16.mxu1 %v788_v15 }
 0x282   :  { %693 = vmatmul.mubr.msk.bf16.vlgmr.msra.gmra.mxu1 %vm39_vm0, %v652_v47 }
 0x283   :  { %697 = vmatpush3.bf16.msra.mxu1 %v276_v37  ;;  %698 = vmatprep.mubr.msk.bf16.mxu1 %vm789_vm1, %v788_v15  ;;  %v744_v37 = vld [vmem:[%s988_s6 + $0x8] sm:$0xff]  }
 0x284   :  { %708 = vmatprep.subr.bf16.mxu1 %v788_v15 }
 0x33a   :  { %v213_v48 = vpop.f32.mrf.mxu1 }
 0x33b   :  { %v268_v49 = vpack.c.bf16 %v213_v48, %v213_v48  ;;  %v636_v48 = vld [vmem:[%s985_s3] ss:$0 sm:$0xff] }
 0x33c   :  { %v688_v50 = vpop.f32.mrf.mxu1 }
 0x33d   :  { %699 = vmatmul.mubr.msk.bf16.vlgmr.msra.gmra.mxu1 %vm270_vm3, %v268_v49 }
 0x33e   :  { %v216_v51 = vpop.f32.mrf.mxu1  ;;  %712 = vmatprep.mubr.msk.bf16.mxu1 %vm789_vm1, %v788_v15  ;;  %709 = vmatpush3.bf16.msra.mxu1 %v744_v37 }
 0x33f   :  { %710 = vmatprep.subr.bf16.mxu1 %v788_v15 }
 0x340   :  { %v689_v52 = vpop.f32.mrf.mxu1 }
 0x341   :  { %v637_v52 = vld [vmem:[%s986_s4] ss:$0 sm:$0xff] }
 0x342   :  { %v262_v53 = vpop.f32.mrf.mxu1  ;;  %711 = vmatpush3.bf16.msra.mxu1 %v745_v38 }
 0x343   :  { %v269_v54 = vpack.c.bf16 %v262_v53, %v262_v53 }
 0x344   :  { %v694_v55 = vpop.f32.mrf.mxu1 }
 0x345   :  { %705 = vmatmul.mubr.msk.bf16.vlgmr.msra.gmra.mxu0 %vm270_vm3, %v269_v54 }
 0x346   :  { %v265_v56 = vpop.f32.mrf.mxu1  ;;  %732 = vmatprep.mubr.msk.bf16.mxu0 %vm789_vm1, %v788_v15  ;;  %717 = vmatpush3.bf16.msra.mxu0 %v746_v39 }
 0x347   :  { %718 = vmatprep.subr.bf16.mxu0 %v788_v15 }
 0x348   :  { %v695_v57 = vpop.f32.mrf.mxu1 }
 0x349   :  { %v747_v57 = vld [vmem:[%s990_s8 + $0x30] sm:$0xff]  }
 0x34a   :  { %719 = vmatpush3.bf16.msra.mxu0 %v747_v57 }
 0x34b   :  { %720 = vmatprep.subr.bf16.mxu0 %v788_v15 }
 0x34e   :  { %721 = vmatpush3.bf16.msra.mxu0 %v748_v58 }
 0x34f   :  { %722 = vmatprep.subr.bf16.mxu0 %v788_v15 }
 0x352   :  { %723 = vmatpush3.bf16.msra.mxu0 %v749_v59 }
 0x353   :  { %724 = vmatprep.subr.bf16.mxu0 %v788_v15 }
 0x356   :  { %725 = vmatpush3.bf16.msra.mxu0 %v750_v60 }
 0x357   :  { %726 = vmatprep.subr.bf16.mxu0 %v788_v15 }
 0x35a   :  { %727 = vmatpush3.bf16.msra.mxu0 %v751_v61 }
 0x35b   :  { %728 = vmatprep.subr.bf16.mxu0 %v788_v15 }
 0x35e   :  { %729 = vmatpush3.bf16.msra.mxu0 %v752_v62 }
 0x35f   :  { %730 = vmatprep.subr.bf16.mxu0 %v788_v15 }
 0x362   :  { %731 = vmatpush3.bf16.msra.mxu0 %v753_v63 }
 0x3fd   :  { %v312_v8 = vpop.f32.mrf.mxu1 }
 0x3fe   :  { %v364_v10 = vmul.f32 0.022097087, %v312_v8 }
 0x3ff   :  { %v700_v12 = vpop.f32.mrf.mxu1 }
 0x400   :  { %v911_v13 = vadd.f32 %v366_v11, %v364_v10 }
 0x401   :  { %v315_v14 = vpop.f32.mrf.mxu1 }
 0x402   :  { %v370_v16 = vsel %vm39_vm0, %v911_v13, 0.0 }
 0x403   :  { %371 = vadd.xlane.f32.xlu1 %v370_v16  ;;  %v701_v18 = vpop.f32.mrf.mxu1 }
 0x405   :  { %v358_v19 = vpop.f32.mrf.mxu0 }
 0x406   :  { %v365_v20 = vmul.f32 0.022097087, %v358_v19  ;;  %v642_v19 = vld [vmem:[%s991_s9] ss:$0 sm:$0xff] }
 0x407   :  { %v706_v22 = vpop.f32.mrf.mxu0 }
 0x408   :  { %v916_v23 = vadd.f32 %v367_v21, %v365_v20 }
 0x409   :  { %v361_v24 = vpop.f32.mrf.mxu0 }
 0x40a   :  { %v373_v25 = vsel %vm39_vm0, %v916_v23, 0.0 }
 0x40b   :  { %374 = vadd.xlane.f32.xlu0 %v373_v25  ;;  %v707_v26 = vpop.f32.mrf.mxu0 }
 0x48c   :  { %v372_v27 = vpop.xlane.xlu1 %371 }
 0x48d   :  { %v376_v28 = vmul.f32 0.03125, %v372_v27 }
 0x48f   :  { %v378_v29 = vsub.f32 %v911_v13, %v376_v28 }
 0x491   :  { %v380_v30 = vmul.f32 %v378_v29, %v378_v29 }
 0x493   :  { %v382_v31 = vsel %vm39_vm0, %v380_v30, 0.0 }
 0x494   :  { %v375_v33 = vpop.xlane.xlu0 %374  ;;  %383 = vadd.xlane.f32.xlu0 %v382_v31 }
 0x495   :  { %v377_v34 = vmul.f32 0.03125, %v375_v33 }
 0x497   :  { %v379_v32 = vsub.f32 %v916_v23, %v377_v34 }
 0x499   :  { %v381_v35 = vmul.f32 %v379_v32, %v379_v32 }
 0x49b   :  { %v385_v36 = vsel %vm39_vm0, %v381_v35, 0.0 }
 0x49c   :  { %386 = vadd.xlane.f32.xlu1 %v385_v36 }
 0x51d   :  { %v384_v40 = vpop.xlane.xlu0 %383 }
 0x51e   :  { %v388_v41 = vmul.f32 0.03125, %v384_v40 }
 0x520   :  { %v390_v42 = vadd.f32 1e-05, %v388_v41 }
 0x522   :  { %758 = vrsqrt.f32 %v390_v42 }
 0x525   :  { %v387_v43 = vpop.xlane.xlu1 %386 }
 0x526   :  { %v389_v44 = vmul.f32 0.03125, %v387_v43 }
 0x528   :  { %v391_v45 = vadd.f32 1e-05, %v389_v44 }
 0x52a   :  { %760 = vrsqrt.f32 %v391_v45 }
 0x52f   :  { %v759_v46 = vpop.eup %758 }
 0x530   :  { %v394_v47 = vmul.f32 %v759_v46, %v378_v29 }
 0x532   :  { %v403_v51 = vmul.f32 %v636_v48, %v394_v47 }
 0x534   :  { %v412_v54 = vadd.f32 %v637_v52, %v403_v51 }
 0x537   :  { %v761_v49 = vpop.eup %760 }
 0x538   :  { %v395_v50 = vmul.f32 %v761_v49, %v379_v32 }
 0x53a   :  { %v404_v53 = vmul.f32 %v636_v48, %v395_v50 }
 0x53c   :  { %v413_v55 = vadd.f32 %v637_v52, %v404_v53 }
 0x53e   :  { %v414_v56 = vpack.c.bf16 %v413_v55, %v412_v54 }
 0x540   :  { %713 = vmatmul.mubr.msk.bf16.vlgmr.msra.gmra.mxu1 %vm39_vm0, %v414_v56 }
 0x600   :  { %v475_v1 = vpop.f32.mrf.mxu1 }
 0x601   :  { %v476_v2 = vadd.f32 %v638_v0, %v475_v1 }
 0x602   :  { %v714_v3 = vpop.f32.mrf.mxu1 }
 0x603   :  { %v484_v4 = vmul.f32 0.70710677, %v476_v2  ;;  %v482_v11 = vmul.f32 0.5, %v476_v2 }
 0x604   :  { %v478_v5 = vpop.f32.mrf.mxu1 }
 0x605   :  { %762 = verf.f32 %v484_v4  ;;  %v479_v6 = vadd.f32 %v638_v0, %v478_v5 }
 0x606   :  { %v715_v7 = vpop.f32.mrf.mxu1 }
 0x607   :  { %v485_v8 = vmul.f32 0.70710677, %v479_v6  ;;  %v483_v12 = vmul.f32 0.5, %v479_v6 }
 0x609   :  { %764 = verf.f32 %v485_v8 }
 0x612   :  { %v763_v15 = vpop.eup %762 }
 0x613   :  { %v488_v9 = vadd.f32 1.0, %v763_v15 }
 0x615   :  { %v490_v16 = vmul.f32 %v488_v9, %v482_v11 }
 0x616   :  { %v765_v10 = vpop.eup %764 }
 0x617   :  { %v489_v14 = vadd.f32 1.0, %v765_v10 }
 0x619   :  { %v491_v17 = vmul.f32 %v489_v14, %v483_v12 }
 0x61b   :  { %v492_v18 = vpack.c.bf16 %v491_v17, %v490_v16 }
 0x61d   :  { %733 = vmatmul.mubr.bf16.vlgmr.msra.gmra.mxu0 %v492_v18 }
 0x6dd   :  { %v598_v20 = vpop.f32.mrf.mxu0 }
 0x6de   :  { %v599_v21 = vadd.f32 %v642_v19, %v598_v20 }
 0x6df   :  { %v734_v22 = vpop.f32.mrf.mxu0 }
 0x6e0   :  { %v605_v24 = vadd.f32 %v599_v21, %v911_v13 }
 0x6e1   :  { %v601_v25 = vpop.f32.mrf.mxu0 }
 0x6e2   :  { %607 = vst.msk [vmem:[#allocation2] sm:$0xff] %vm39_vm0, %v605_v24  ;;  %v602_v26 = vadd.f32 %v642_v19, %v601_v25 }
 0x6e3   :  { %v735_v27 = vpop.f32.mrf.mxu0 }
 0x6e4   :  { %v606_v28 = vadd.f32 %v602_v26, %v916_v23 }
 0x6e6   :  { %608 = vst.msk [vmem:[#allocation2 + $0x8] sm:$0xff] %vm39_vm0, %v606_v28 }
 0x6e7   :  { %777 = shalt.err (!%p774_p4)
}
 0x6e8   :  { %s792_s9 = smov 128   ;;  %s793_s24 = smov 8  }
 0x6e9   :  { %620 = dma.vmem_to_hbm [thread:$0]  %s615_s2, 256, %s992_s10, [#allocation3], %s792_s9, %s792_s9, %s793_s24  }
 0x6ea   :  { %786 = dma.done.wait [#allocation3], 256  }
 0x6eb   :  { %787 = vsyncadd [#allocation3], 4294967040 }
 0x6ec   :  { %624 = vsyncpa [#allocation3], 1 }

</bundles_post_ra>
